<compile_context>
chip_gen: v7x
topology: tpu7x:2x2x1
jax: 0.10.0
libtpu: 0.0.40
codegen_flags: <defaults>
</compile_context>

<pallas_src>
import jax
import jax.numpy as jnp
from jax.experimental import pallas as pl
from jax.experimental.pallas import tpu as pltpu


def _predictor_kernel(x_ref, wt_ref, b_ref, o_ref):
    # x_ref: [TM, D], wt_ref: [D, C] (pre-transposed), b_ref: [1, C], o_ref: [TM, C]
    acc = jnp.dot(x_ref[...], wt_ref[...], preferred_element_type=jnp.float32)
    o_ref[...] = (acc + b_ref[...]).astype(o_ref.dtype)


def node_classification_forward(graph_embed, weight, bias, *,
                                small_n_bypass=4096,
                                vmem_budget_bytes=12 << 20,
                                max_block_rows=32768,
                                min_grid_steps=4,
                                force_pallas=False):
    """Pallas equivalent of NodeClassificationModel.forward on an encoded batch.

    Args:
      graph_embed: [N, D] float32 — output of the (external) graph encoder.
      weight:      [C, D] float32 — nn.Linear weight (PyTorch convention).
      bias:        [C]    float32 — nn.Linear bias.
      small_n_bypass: below this N, return plain-JAX matmul (launch overhead
                      dominates the 2*N*D*C FLOPs at these widths).
      vmem_budget_bytes: cap for the double-buffered (x tile + out tile) f32
                      footprint; default fits v5e's 16 MiB scoped-VMEM default.
      max_block_rows: hard cap on the row tile.
      min_grid_steps: keep at least this many grid steps on the tiled path so
                      the "parallel" row axis shards across v7x's two TCs.
      force_pallas:   skip the small-N bypass (testing).
    Returns:
      pred_scores: [N, C] float32.
    """
    n, d = graph_embed.shape
    c = weight.shape[0]

    # Small-N bypass: let XLA fuse this into surrounding work instead of paying
    # custom-call + pipeline-priming cost for a few KFLOPs.
    if n < small_n_bypass and not force_pallas:
        return graph_embed @ weight.T + bias

    # ---- Row-tile selection -------------------------------------------------
    # Double-buffered per-step footprint: 2 * tm * (D + C) * 4 bytes (x + out),
    # plus the tiny VMEM-resident W/bias.  Keep it under the budget, under the
    # hard cap, and keep >= min_grid_steps grid steps for megacore sharding.
    bytes_per_row = 4 * (d + c)
    tm_vmem = (vmem_budget_bytes // (2 * bytes_per_row)) // 8 * 8
    tm_steps = (-(-n // min_grid_steps) + 7) // 8 * 8    # ceil(n/steps) -> mult of 8
    tm = max(8, min(tm_vmem, tm_steps, max_block_rows))
    grid = (pl.cdiv(n, tm),)

    # Trace-time relayouts of tiny parameter tensors (no HBM-sized copies):
    wt = weight.T            # [D, C] — standard (1,0) contraction, no trans-B lowering
    b2 = bias.reshape(1, c)  # metadata-only reshape

    cost = pl.CostEstimate(
        flops=2 * n * d * c,
        transcendentals=0,
        bytes_accessed=4 * (n * d + c * d + c + n * c),
    )

    return pl.pallas_call(
        _predictor_kernel,
        out_shape=jax.ShapeDtypeStruct((n, c), jnp.float32),
        grid=grid,
        in_specs=[
            pl.BlockSpec((tm, d), lambda i: (i, 0)),   # x: tiled over rows, pipelined
            pl.BlockSpec((d, c), lambda i: (0, 0)),    # W^T: VMEM-resident
            pl.BlockSpec((1, c), lambda i: (0, 0)),    # bias: VMEM-resident
        ],
        out_specs=pl.BlockSpec((tm, c), lambda i: (i, 0)),
        compiler_params=pltpu.CompilerParams(
            dimension_semantics=("parallel",),         # megacore-shard row blocks
        ),
        cost_estimate=cost,
    )(graph_embed, wt, b2)


if __name__ == "__main__":
    # Small shapes consistent with the module: batch of 8 graphs,
    # encoder_dim=32, num_of_classes=8.
    N, ENCODER_DIM, NUM_CLASSES = 8, 32, 8

    key = jax.random.PRNGKey(0)
    k_emb, k_w, k_b = jax.random.split(key, 3)

    # Stand-in for the (fixed) encoder output: deterministic graph embeddings.
    graph_embed = jax.random.normal(k_emb, (N, ENCODER_DIM), dtype=jnp.float32)

    # Deterministic predictor parameters (nn.Linear(encoder_dim, num_classes)).
    bound = 1.0 / (ENCODER_DIM ** 0.5)
    weight = jax.random.uniform(k_w, (NUM_CLASSES, ENCODER_DIM),
                                minval=-bound, maxval=bound, dtype=jnp.float32)
    bias = jax.random.uniform(k_b, (NUM_CLASSES,),
                              minval=-bound, maxval=bound, dtype=jnp.float32)

    ref = graph_embed @ weight.T + bias

    # 1) Module-sized shapes, Pallas path forced (exercise the kernel itself).
    pred_scores = node_classification_forward(graph_embed, weight, bias,
                                              force_pallas=True)
    jax.block_until_ready(pred_scores)
    assert pred_scores.shape == (N, NUM_CLASSES)
    assert jnp.allclose(pred_scores, ref, atol=1e-5, rtol=1e-5)

    # 2) Module-sized shapes, default path (small-N bypass -> plain JAX).
    pred_bypass = node_classification_forward(graph_embed, weight, bias)
    jax.block_until_ready(pred_bypass)
    assert jnp.allclose(pred_bypass, ref, atol=1e-5, rtol=1e-5)

    # 3) Large-N path: multi-step grid (>= 4 steps), big row tiles, ragged last block.
    N_BIG = 20000
    x_big = jax.random.normal(jax.random.PRNGKey(1), (N_BIG, ENCODER_DIM),
                              dtype=jnp.float32)
    out_big = node_classification_forward(x_big, weight, bias)
    jax.block_until_ready(out_big)
    ref_big = x_big @ weight.T + bias
    assert out_big.shape == (N_BIG, NUM_CLASSES)
    assert jnp.allclose(out_big, ref_big, atol=1e-4, rtol=1e-4)

    # 4) Ragged-last-block sanity at a non-multiple N.
    N_RAG = 10001
    x_rag = jax.random.normal(jax.random.PRNGKey(2), (N_RAG, ENCODER_DIM),
                              dtype=jnp.float32)
    out_rag = node_classification_forward(x_rag, weight, bias)
    jax.block_until_ready(out_rag)
    ref_rag = x_rag @ weight.T + bias
    assert jnp.allclose(out_rag, ref_rag, atol=1e-4, rtol=1e-4)

    print("KERNEL_OK")
</pallas_src>

<mosaic_0001>
module attributes {stable_mosaic.version = 11 : i64} {
  func.func @_predictor_kernel(%arg0: i32, %arg1: memref<8x32xf32, #tpu.memory_space<vmem>>, %arg2: memref<32x8xf32, #tpu.memory_space<vmem>>, %arg3: memref<1x8xf32, #tpu.memory_space<vmem>>, %arg4: memref<8x8xf32, #tpu.memory_space<vmem>>) attributes {dimension_semantics = [#tpu.dimension_semantics<parallel>], iteration_bounds = array<i64: 1>, scalar_prefetch = 0 : i64, scratch_operands = 0 : i64, tpu.core_type = #tpu.core_type<tc>, window_params = [{transform_indices = @transform_0, window_bounds = array<i64: 8, 32>}, {pipeline_mode = #tpu.pipeline_mode<synchronous>, transform_indices = @transform_1, window_bounds = array<i64: 32, 8>}, {pipeline_mode = #tpu.pipeline_mode<synchronous>, transform_indices = @transform_2, window_bounds = array<i64: 1, 8>}, {transform_indices = @transform_3, window_bounds = array<i64: 8, 8>}]} {
    %c0 = arith.constant 0 : index
    %c0_0 = arith.constant 0 : index
    %0 = vector.load %arg1[%c0, %c0_0] : memref<8x32xf32, #tpu.memory_space<vmem>>, vector<8x32xf32>
    %c0_1 = arith.constant 0 : index
    %c0_2 = arith.constant 0 : index
    %1 = vector.load %arg2[%c0_1, %c0_2] : memref<32x8xf32, #tpu.memory_space<vmem>>, vector<32x8xf32>
    %cst = arith.constant dense<0.000000e+00> : vector<8x8xf32>
    %2 = tpu.matmul %0, %1, %cst {dimension_numbers = #tpu.dot_dimension_numbers<[1], [0], [0], [1], [0, 0, 1, 1], [], []>} : vector<8x32xf32>, vector<32x8xf32>, vector<8x8xf32> -> vector<8x8xf32>
    %c0_3 = arith.constant 0 : index
    %c0_4 = arith.constant 0 : index
    %3 = vector.load %arg3[%c0_3, %c0_4] : memref<1x8xf32, #tpu.memory_space<vmem>>, vector<1x8xf32>
    %4 = vector.broadcast %3 : vector<1x8xf32> to vector<8x8xf32>
    %5 = arith.addf %2, %4 : vector<8x8xf32>
    %c0_5 = arith.constant 0 : index
    %c0_6 = arith.constant 0 : index
    %6 = vector.load %arg4[%c0_5, %c0_6] : memref<8x8xf32, #tpu.memory_space<vmem>>, vector<8x8xf32>
    tpu.vector_store %arg4[%c0_5, %c0_6], %5 {strides = array<i32>} : memref<8x8xf32, #tpu.memory_space<vmem>>, vector<8x8xf32>,
    return
  }
  func.func @transform_0(%arg0: i32) -> (i32, i32) {
    %c0_i32 = arith.constant 0 : i32
    %c0_i32_0 = arith.constant 0 : i32
    return %arg0, %c0_i32 : i32, i32
  }
  func.func @transform_1(%arg0: i32) -> (i32, i32) {
    %c0_i32 = arith.constant 0 : i32
    %c0_i32_0 = arith.constant 0 : i32
    %c0_i32_1 = arith.constant 0 : i32
    return %c0_i32, %c0_i32_0 : i32, i32
  }
  func.func @transform_2(%arg0: i32) -> (i32, i32) {
    %c0_i32 = arith.constant 0 : i32
    %c0_i32_0 = arith.constant 0 : i32
    %c0_i32_1 = arith.constant 0 : i32
    return %c0_i32, %c0_i32_0 : i32, i32
  }
  func.func @transform_3(%arg0: i32) -> (i32, i32) {
    %c0_i32 = arith.constant 0 : i32
    %c0_i32_0 = arith.constant 0 : i32
    return %arg0, %c0_i32 : i32, i32
  }
}

</mosaic_0001>

<bundles_post_ra>
// kernel: tpu_custom_call.1
= control target key start
LH: loop header
LB: loop body
LE: loop exit
PB: predicated region body
PF: predicated region fallthrough
CT: control target
= control target key end

     0   :  { %v169_v3 = vmov 0.0|0.0   ;;  %vm170_vm0 = vmmov 0   ;;  %v171_v6 = vmov 0.0   ;;  %s223_s0 = inlined_call_operand.vmem [shape: f32[8,32], index: 0, kind: input, shape index: {}]   ;;  %s224_s1 = inlined_call_operand.vmem [shape: f32[32,8], index: 1, kind: input, shape index: {}]   ;;  %s225_s2 = inlined_call_operand.vmem [shape: f32[1,8], index: 2, kind: input, shape index: {}]   ;;  %s226_s3 = inlined_call_operand.hbm [shape: f32[8,8], index: 3, kind: output, shape index: {}]  }
   0x1   :  { %v16_v0 = vld [vmem:[%s224_s1] sm:$0xff]  ;;  %v17_v1 = vld [vmem:[%s224_s1 + $0x8] sm:$0xff]  ;;  %v18_v2 = vld [vmem:[%s224_s1 + $0x10] sm:$0xff]  ;;  %135 = vmatprep.subr.bf16.mxu0 %v169_v3  ;;  %132 = vmatprep.mubr.msk.f32.mxu0 %vm170_vm0, %v171_v6 }
   0x2   :  { %v136_v4 = vpack.c.bf16 %v17_v1, %v16_v0  ;;  %v19_v5 = vld [vmem:[%s224_s1 + $0x18] sm:$0xff] }
   0x3   :  { %8 = vsyncpa [#allocation3], 0  ;;  %v139_v7 = vpack.c.bf16 %v19_v5, %v18_v2  ;;  %v15_v8 = vld [vmem:[%s223_s0] sm:$0xff]  ;;  %vm27_vm1 = vcmask 261120   ;;  %s172_s24 = smov [#allocation2]   ;;  %vm101_vm2 = vcmask 64512  }
   0x4   :  { %137 = vmatpush3.bf16.msra.mxu0 %v136_v4  ;;  %v117_v9 = vld [vmem:[%s225_s2] ss:$0 sm:$0xff]  ;;  %s109_s1 = sshll.u32 %s172_s24, 4  ;;  %s110_s1 = int_to_ptr.vmem [resolvable:$true] %s109_s1 }
   0x5   :  { %138 = vmatprep.subr.bf16.mxu0 %v169_v3  ;;  %s145_s25 = scalar_lea.vmem %s110_s1, 128  ;;  %p150_p1 = scmp.lt.s32.totalorder %s110_s1, %s110_s1 }
   0x6   :  { %p146_p0 = scmp.ne.s32.totalorder %s110_s1, %s145_s25  ;;  %p151_p2 = scmp.lt.s32.totalorder %s145_s25, %s145_s25 }
   0x8   :  { %140 = vmatpush3.bf16.msra.mxu0 %v139_v7  ;;  %p152_p3 = por %p151_p2, %p150_p1 }
   0xa   :  { %p153_p4 = pnand %p152_p3, %p146_p0 }
   0xb   :  { %133 = vmatmul.mubr.msk.f32.vlgmr.msra.gmra.mrb[0].mxu0 %vm27_vm1, %v15_v8 }
  0xde   :  { %v97_v10 = vpop.f32.mrb[0].mxu0 }
  0xdf   :  { %v98_v11 = vadd.f32 %v117_v9, %v97_v10  ;;  %v134_v12 = vpop.f32.mrb[1].mxu0 }
  0xe1   :  { %102 = vst.msk [vmem:[#allocation2] sm:$0xff] %vm101_vm2, %v98_v11 }
  0xe2   :  { %156 = shalt.err (!%p153_p4)
}
  0xe3   :  { %s157_s27 = scalar_lea.hbm %s226_s3, 128 }
  0xe4   :  { %p158_p5 = scmp.ne.s32.totalorder %s226_s3, %s157_s27  ;;  %p161_p6 = scmp.lt.u32.totalorder %s157_s27, %s226_s3 }
  0xe6   :  { %p163_p7 = pnand %p161_p6, %p158_p5 }
  0xe8   :  { %166 = shalt.err (!%p163_p7)
}
  0xe9   :  { %112 = dma.vmem_to_hbm [thread:$0]  %s110_s1, 128, %s226_s3, [#allocation3]  }
  0xea   :  { %167 = dma.done.wait [#allocation3], 128  }
  0xeb   :  { %168 = vsyncadd [#allocation3], 4294967168 }
  0xec   :  { %116 = vsyncpa [#allocation3], 1 }

</bundles_post_ra>
